<compile_context>
chip_gen: v7x
topology: tpu7x:2x2x1
jax: 0.10.0
libtpu: 0.0.40
codegen_flags: <defaults>
</compile_context>

<pallas_src>
import math

import jax
import jax.numpy as jnp
from jax.experimental import pallas as pl
from jax.experimental.pallas import tpu as pltpu

LN_EPS = 1e-12
VMEM_LIMIT = 32 * 1024 * 1024  # safe on v5e/v6e (128 MiB) and v7x (64 MiB physical)


# ----------------------------------------------------------------------------
# shared math helpers (used both inside kernels and in the pure-JAX reference)
# ----------------------------------------------------------------------------
def _gelu(x):
    # tanh-approximate GELU (tanh lowers to the EUP on TPU).
    c = math.sqrt(2.0 / math.pi)
    return 0.5 * x * (1.0 + jnp.tanh(c * (x + 0.044715 * x * x * x)))


def _layernorm(x, gamma, beta):
    mu = jnp.mean(x, axis=-1, keepdims=True)
    var = jnp.mean(jnp.square(x - mu), axis=-1, keepdims=True)
    return (x - mu) * jax.lax.rsqrt(var + LN_EPS) * gamma + beta


# ----------------------------------------------------------------------------
# kernels
# ----------------------------------------------------------------------------
def embed_ln_kernel(we_ref, pos_ref, g_ref, b_ref, o_ref):
    # we_ref : (Bt, S, H) gathered word embeddings
    # pos_ref: (S, H)     position + token-type embeddings (shared across rows)
    x = we_ref[...].astype(jnp.float32) + pos_ref[...].astype(jnp.float32)
    out = _layernorm(x, g_ref[...].astype(jnp.float32), b_ref[...].astype(jnp.float32))
    o_ref[...] = out.astype(o_ref.dtype)


def make_bert_layer_kernel(num_heads):
    def kernel(x_ref, mask_ref,
               wq_ref, bq_ref, wk_ref, bk_ref, wv_ref, bv_ref,
               wo_ref, bo_ref, g1_ref, be1_ref,
               w1_ref, b1_ref, w2_ref, b2_ref, g2_ref, be2_ref,
               o_ref):
        bt, s, h = x_ref.shape
        dh = h // num_heads
        scale = 1.0 / math.sqrt(dh)

        # Upcast only for the accumulation-sensitive math (softmax / LayerNorm /
        # matmul accumulators); demo inputs are already f32 so this is a no-op.
        x = x_ref[...].astype(jnp.float32)              # (Bt, S, H)
        x2 = x.reshape(bt * s, h)

        # ---- QKV projections (MXU, f32 accumulate) ----
        q = jnp.dot(x2, wq_ref[...], preferred_element_type=jnp.float32) + bq_ref[...]
        k = jnp.dot(x2, wk_ref[...], preferred_element_type=jnp.float32) + bk_ref[...]
        v = jnp.dot(x2, wv_ref[...], preferred_element_type=jnp.float32) + bv_ref[...]
        q = q.reshape(bt, s, h)
        k = k.reshape(bt, s, h)
        v = v.reshape(bt, s, h)

        am = mask_ref[...].astype(jnp.float32)          # (Bt, 1, S) additive mask
        wo = wo_ref[...]

        # ---- multi-head attention: per-head (static unrolled) to avoid 4-D
        #      transposes; output projection folded per head and summed. ----
        attn = None
        for hh in range(num_heads):
            lo = hh * dh
            qh = q[:, :, lo:lo + dh]
            kh = k[:, :, lo:lo + dh]
            vh = v[:, :, lo:lo + dh]
            sc = jnp.einsum('bqd,bkd->bqk', qh, kh,
                            preferred_element_type=jnp.float32) * scale
            sc = sc + am                                # mask over key positions
            m = jnp.max(sc, axis=-1, keepdims=True)
            p = jnp.exp(sc - m)
            p = p / jnp.sum(p, axis=-1, keepdims=True)
            ctx_h = jnp.einsum('bqk,bkd->bqd', p, vh,
                               preferred_element_type=jnp.float32)
            part = jnp.dot(ctx_h.reshape(bt * s, dh), wo[lo:lo + dh, :],
                           preferred_element_type=jnp.float32)
            attn = part if attn is None else attn + part
        attn = attn + bo_ref[...]

        # ---- residual + LayerNorm 1 ----
        h1 = _layernorm(x2 + attn, g1_ref[...], be1_ref[...])

        # ---- FFN (GELU) + residual + LayerNorm 2 ----
        f = jnp.dot(h1, w1_ref[...], preferred_element_type=jnp.float32) + b1_ref[...]
        f = _gelu(f)
        f = jnp.dot(f, w2_ref[...], preferred_element_type=jnp.float32) + b2_ref[...]
        h2 = _layernorm(h1 + f, g2_ref[...], be2_ref[...])

        o_ref[...] = h2.reshape(bt, s, h).astype(o_ref.dtype)

    return kernel


# ----------------------------------------------------------------------------
# wrappers
# ----------------------------------------------------------------------------
def _bcast_spec(shape):
    """Full-array block replicated to every grid step (weights, biases)."""
    zeros = (0,) * len(shape)
    return pl.BlockSpec(shape, lambda b, zeros=zeros: zeros)


def _pick_bt(nb, s, h, f, itemsize, vmem_budget=16 * 1024 * 1024):
    """Largest divisor of NB whose double-buffered tiles + working set fit the
    budget; prefer a grid of >= 2 steps so v7x's two TensorCores both get work."""
    divisors = [d for d in range(1, nb + 1) if nb % d == 0]

    def fits(bt):
        tile = bt * s * max(h, f) * max(itemsize, 4)
        # in + out blocks, double buffered, ~4x headroom for QKV/scores/FFN temps
        return 2 * 2 * tile * 4 <= vmem_budget

    ok = [d for d in divisors if fits(d)]
    if not ok:
        return 1
    multi = [d for d in ok if nb // d >= 2]
    return max(multi) if multi else max(ok)


def embed_layernorm(word_gathered, pos_type, gamma, beta, bt):
    NB, S, H = word_gathered.shape
    return pl.pallas_call(
        embed_ln_kernel,
        out_shape=jax.ShapeDtypeStruct((NB, S, H), word_gathered.dtype),
        grid_spec=pltpu.PrefetchScalarGridSpec(
            num_scalar_prefetch=0,
            grid=(NB // bt,),
            in_specs=[
                pl.BlockSpec((bt, S, H), lambda i: (i, 0, 0)),
                _bcast_spec((S, H)),
                _bcast_spec((1, H)),
                _bcast_spec((1, H)),
            ],
            out_specs=pl.BlockSpec((bt, S, H), lambda i: (i, 0, 0)),
        ),
        compiler_params=pltpu.CompilerParams(
            dimension_semantics=("parallel",),
            vmem_limit_bytes=VMEM_LIMIT),
    )(word_gathered, pos_type, gamma, beta)


def bert_layer(x, add_mask, lp, num_heads, bt):
    NB, S, H = x.shape
    F = lp['w1'].shape[1]
    return pl.pallas_call(
        make_bert_layer_kernel(num_heads),
        out_shape=jax.ShapeDtypeStruct((NB, S, H), x.dtype),
        grid_spec=pltpu.PrefetchScalarGridSpec(
            num_scalar_prefetch=0,
            grid=(NB // bt,),
            in_specs=[
                pl.BlockSpec((bt, S, H), lambda b: (b, 0, 0)),
                pl.BlockSpec((bt, 1, S), lambda b: (b, 0, 0)),
                _bcast_spec((H, H)), _bcast_spec((1, H)),   # wq, bq
                _bcast_spec((H, H)), _bcast_spec((1, H)),   # wk, bk
                _bcast_spec((H, H)), _bcast_spec((1, H)),   # wv, bv
                _bcast_spec((H, H)), _bcast_spec((1, H)),   # wo, bo
                _bcast_spec((1, H)), _bcast_spec((1, H)),   # ln1 gamma, beta
                _bcast_spec((H, F)), _bcast_spec((1, F)),   # ffn w1, b1
                _bcast_spec((F, H)), _bcast_spec((1, H)),   # ffn w2, b2
                _bcast_spec((1, H)), _bcast_spec((1, H)),   # ln2 gamma, beta
            ],
            out_specs=pl.BlockSpec((bt, S, H), lambda b: (b, 0, 0)),
        ),
        compiler_params=pltpu.CompilerParams(
            dimension_semantics=("parallel",),
            vmem_limit_bytes=VMEM_LIMIT),
    )(x, add_mask,
      lp['wq'], lp['bq'], lp['wk'], lp['bk'], lp['wv'], lp['bv'],
      lp['wo'], lp['bo'], lp['g1'], lp['be1'],
      lp['w1'], lp['b1'], lp['w2'], lp['b2'], lp['g2'], lp['be2'])


def bert_for_representation(input_ids_seq, attn_mask_seq, params, *, num_heads):
    """input_ids_seq: (N, B, S) int32; attn_mask_seq: (N, B, S) in {0,1}.
    Returns stacked [CLS] representations (N, B, H) -- matches the PyTorch module."""
    N, B, S = input_ids_seq.shape
    H = params['word_emb'].shape[1]
    F = params['layers'][0]['w1'].shape[1]
    NB = N * B

    ids = input_ids_seq.reshape(NB, S)
    mask = attn_mask_seq.reshape(NB, S).astype(jnp.float32)

    bt = _pick_bt(NB, S, H, F, jnp.dtype(params['word_emb'].dtype).itemsize)

    # TODO(synk): data-dependent vocabulary row-gather stays in the wrapper
    # (jnp.take); a Pallas gather kernel is not worth it at these sizes.
    we = jnp.take(params['word_emb'], ids, axis=0)                       # (NB, S, H)
    pos_type = params['pos_emb'][:S] + params['type_emb'][0][None, :]    # (S, H)

    x = embed_layernorm(we, pos_type, params['emb_gamma'], params['emb_beta'], bt)

    add_mask = ((1.0 - mask) * -10000.0).reshape(NB, 1, S)               # additive mask

    for lp in params['layers']:
        x = bert_layer(x, add_mask, lp, num_heads, bt)

    cls = x[:, 0, :]                       # [CLS] hidden state, (NB, H)
    # dropout after CLS is identity at inference.
    return cls.reshape(N, B, H)


# ----------------------------------------------------------------------------
# pure-JAX reference (HF-style post-LN BERT encoder)
# ----------------------------------------------------------------------------
def reference(input_ids_seq, attn_mask_seq, params, *, num_heads):
    N, B, S = input_ids_seq.shape
    H = params['word_emb'].shape[1]
    nb = N * B
    ids = input_ids_seq.reshape(nb, S)
    mask = attn_mask_seq.reshape(nb, S).astype(jnp.float32)

    x = jnp.take(params['word_emb'], ids, axis=0)
    x = x + params['pos_emb'][:S][None] + params['type_emb'][0][None, None, :]
    x = _layernorm(x, params['emb_gamma'], params['emb_beta'])

    add_mask = ((1.0 - mask) * -10000.0)[:, None, None, :]   # (nb,1,1,S)
    dh = H // num_heads

    for lp in params['layers']:
        x2 = x.reshape(nb * S, H)

        def proj(w, b):
            return (x2 @ w + b).reshape(nb, S, num_heads, dh).transpose(0, 2, 1, 3)

        q, k, v = proj(lp['wq'], lp['bq']), proj(lp['wk'], lp['bk']), proj(lp['wv'], lp['bv'])
        sc = jnp.einsum('bhqd,bhkd->bhqk', q, k) / math.sqrt(dh) + add_mask
        p = jax.nn.softmax(sc, axis=-1)
        ctx = jnp.einsum('bhqk,bhkd->bhqd', p, v).transpose(0, 2, 1, 3).reshape(nb * S, H)
        attn = ctx @ lp['wo'] + lp['bo']
        h1 = _layernorm(x2 + attn, lp['g1'], lp['be1'])
        ff = _gelu(h1 @ lp['w1'] + lp['b1']) @ lp['w2'] + lp['b2']
        x = _layernorm(h1 + ff, lp['g2'], lp['be2']).reshape(nb, S, H)

    return x[:, 0, :].reshape(N, B, H)


# ----------------------------------------------------------------------------
# parameter construction (weights stored (in, out): transposed vs torch Linear)
# ----------------------------------------------------------------------------
def init_params(key, *, vocab, max_pos, hidden, ffn, n_layers):
    scale = 0.05
    k_emb, k_layers = jax.random.split(key)
    ke = jax.random.split(k_emb, 3)
    params = {
        'word_emb': jax.random.normal(ke[0], (vocab, hidden), jnp.float32) * scale,
        'pos_emb': jax.random.normal(ke[1], (max_pos, hidden), jnp.float32) * scale,
        'type_emb': jax.random.normal(ke[2], (2, hidden), jnp.float32) * scale,
        'emb_gamma': jnp.ones((1, hidden), jnp.float32),
        'emb_beta': jnp.zeros((1, hidden), jnp.float32),
        'layers': [],
    }
    for kl in jax.random.split(k_layers, n_layers):
        ks = jax.random.split(kl, 12)
        params['layers'].append({
            'wq': jax.random.normal(ks[0], (hidden, hidden), jnp.float32) * scale,
            'bq': jax.random.normal(ks[1], (1, hidden), jnp.float32) * scale,
            'wk': jax.random.normal(ks[2], (hidden, hidden), jnp.float32) * scale,
            'bk': jax.random.normal(ks[3], (1, hidden), jnp.float32) * scale,
            'wv': jax.random.normal(ks[4], (hidden, hidden), jnp.float32) * scale,
            'bv': jax.random.normal(ks[5], (1, hidden), jnp.float32) * scale,
            'wo': jax.random.normal(ks[6], (hidden, hidden), jnp.float32) * scale,
            'bo': jax.random.normal(ks[7], (1, hidden), jnp.float32) * scale,
            'g1': jnp.ones((1, hidden), jnp.float32),
            'be1': jnp.zeros((1, hidden), jnp.float32),
            'w1': jax.random.normal(ks[8], (hidden, ffn), jnp.float32) * scale,
            'b1': jax.random.normal(ks[9], (1, ffn), jnp.float32) * scale,
            'w2': jax.random.normal(ks[10], (ffn, hidden), jnp.float32) * scale,
            'b2': jax.random.normal(ks[11], (1, hidden), jnp.float32) * scale,
            'g2': jnp.ones((1, hidden), jnp.float32),
            'be2': jnp.zeros((1, hidden), jnp.float32),
        })
    return params


if __name__ == "__main__":
    jax.config.update("jax_default_matmul_precision", "highest")

    # (notes-per-stay, batch, tokens-per-note, hidden, ffn, heads, layers)
    N, B, S = 2, 2, 8
    H, F_FFN, NH, L = 32, 64, 2, 2
    VOCAB, MAX_POS = 64, 32

    key = jax.random.PRNGKey(0)
    kp, kid = jax.random.split(key)
    params = init_params(kp, vocab=VOCAB, max_pos=MAX_POS, hidden=H, ffn=F_FFN, n_layers=L)

    input_ids = jax.random.randint(kid, (N, B, S), 0, VOCAB, dtype=jnp.int32)
    # last two tokens of every note are padding
    attn_mask = jnp.ones((N, B, S), jnp.int32).at[:, :, -2:].set(0)

    out = bert_for_representation(input_ids, attn_mask, params, num_heads=NH)
    jax.block_until_ready(out)

    ref = reference(input_ids, attn_mask, params, num_heads=NH)
    assert out.shape == (N, B, H)
    err = float(jnp.max(jnp.abs(out - ref)))
    assert jnp.allclose(out, ref, atol=1e-3, rtol=1e-3), f"max abs err {err}"

    print("KERNEL_OK")
</pallas_src>

<mosaic_0001>
module attributes {stable_mosaic.version = 11 : i64} {
  func.func @embed_ln_kernel(%arg0: i32, %arg1: memref<2x8x32xf32, #tpu.memory_space<vmem>>, %arg2: memref<8x32xf32, #tpu.memory_space<vmem>>, %arg3: memref<1x32xf32, #tpu.memory_space<vmem>>, %arg4: memref<1x32xf32, #tpu.memory_space<vmem>>, %arg5: memref<2x8x32xf32, #tpu.memory_space<vmem>>) attributes {dimension_semantics = [#tpu.dimension_semantics<parallel>], iteration_bounds = array<i64: 2>, scalar_prefetch = 0 : i64, scratch_operands = 0 : i64, tpu.core_type = #tpu.core_type<tc>, window_params = [{transform_indices = @transform_0, window_bounds = array<i64: 2, 8, 32>}, {pipeline_mode = #tpu.pipeline_mode<synchronous>, transform_indices = @transform_1, window_bounds = array<i64: 8, 32>}, {pipeline_mode = #tpu.pipeline_mode<synchronous>, transform_indices = @transform_2, window_bounds = array<i64: 1, 32>}, {pipeline_mode = #tpu.pipeline_mode<synchronous>, transform_indices = @transform_3, window_bounds = array<i64: 1, 32>}, {transform_indices = @transform_4, window_bounds = array<i64: 2, 8, 32>}]} {
    %c0 = arith.constant 0 : index
    %c0_0 = arith.constant 0 : index
    %c0_1 = arith.constant 0 : index
    %0 = vector.load %arg1[%c0, %c0_0, %c0_1] : memref<2x8x32xf32, #tpu.memory_space<vmem>>, vector<2x8x32xf32>
    %c0_2 = arith.constant 0 : index
    %c0_3 = arith.constant 0 : index
    %1 = vector.load %arg2[%c0_2, %c0_3] : memref<8x32xf32, #tpu.memory_space<vmem>>, vector<8x32xf32>
    %2 = vector.shape_cast %1 : vector<8x32xf32> to vector<1x8x32xf32>
    %3 = vector.broadcast %2 : vector<1x8x32xf32> to vector<2x8x32xf32>
    %4 = arith.addf %0, %3 : vector<2x8x32xf32>
    %c0_4 = arith.constant 0 : index
    %c0_5 = arith.constant 0 : index
    %5 = vector.load %arg3[%c0_4, %c0_5] : memref<1x32xf32, #tpu.memory_space<vmem>>, vector<1x32xf32>
    %c0_6 = arith.constant 0 : index
    %c0_7 = arith.constant 0 : index
    %6 = vector.load %arg4[%c0_6, %c0_7] : memref<1x32xf32, #tpu.memory_space<vmem>>, vector<1x32xf32>
    %cst = arith.constant dense<0.000000e+00> : vector<2x8xf32>
    %7 = vector.multi_reduction <add>, %4, %cst [2] : vector<2x8x32xf32> to vector<2x8xf32>
    %8 = vector.shape_cast %7 : vector<2x8xf32> to vector<2x8x1xf32>
    %cst_8 = arith.constant 3.200000e+01 : f32
    %9 = vector.broadcast %cst_8 : f32 to vector<2x8x1xf32>
    %10 = arith.divf %8, %9 : vector<2x8x1xf32>
    %11 = vector.broadcast %10 : vector<2x8x1xf32> to vector<2x8x32xf32>
    %12 = arith.subf %4, %11 : vector<2x8x32xf32>
    %13 = arith.mulf %12, %12 : vector<2x8x32xf32>
    %cst_9 = arith.constant dense<0.000000e+00> : vector<2x8xf32>
    %14 = vector.multi_reduction <add>, %13, %cst_9 [2] : vector<2x8x32xf32> to vector<2x8xf32>
    %15 = vector.shape_cast %14 : vector<2x8xf32> to vector<2x8x1xf32>
    %cst_10 = arith.constant 3.200000e+01 : f32
    %16 = vector.broadcast %cst_10 : f32 to vector<2x8x1xf32>
    %17 = arith.divf %15, %16 : vector<2x8x1xf32>
    %18 = vector.broadcast %10 : vector<2x8x1xf32> to vector<2x8x32xf32>
    %19 = arith.subf %4, %18 : vector<2x8x32xf32>
    %cst_11 = arith.constant 9.99999996E-13 : f32
    %20 = vector.broadcast %cst_11 : f32 to vector<2x8x1xf32>
    %21 = arith.addf %17, %20 : vector<2x8x1xf32>
    %22 = math.rsqrt %21 : vector<2x8x1xf32>
    %23 = vector.broadcast %22 : vector<2x8x1xf32> to vector<2x8x32xf32>
    %24 = arith.mulf %19, %23 : vector<2x8x32xf32>
    %25 = vector.shape_cast %5 : vector<1x32xf32> to vector<1x1x32xf32>
    %26 = vector.broadcast %25 : vector<1x1x32xf32> to vector<2x8x32xf32>
    %27 = arith.mulf %24, %26 : vector<2x8x32xf32>
    %28 = vector.shape_cast %6 : vector<1x32xf32> to vector<1x1x32xf32>
    %29 = vector.broadcast %28 : vector<1x1x32xf32> to vector<2x8x32xf32>
    %30 = arith.addf %27, %29 : vector<2x8x32xf32>
    %c0_12 = arith.constant 0 : index
    %c0_13 = arith.constant 0 : index
    %c0_14 = arith.constant 0 : index
    %31 = vector.load %arg5[%c0_12, %c0_13, %c0_14] : memref<2x8x32xf32, #tpu.memory_space<vmem>>, vector<2x8x32xf32>
    tpu.vector_store %arg5[%c0_12, %c0_13, %c0_14], %30 {strides = array<i32>} : memref<2x8x32xf32, #tpu.memory_space<vmem>>, vector<2x8x32xf32>,
    return
  }
  func.func @transform_0(%arg0: i32) -> (i32, i32, i32) {
    %c0_i32 = arith.constant 0 : i32
    %c0_i32_0 = arith.constant 0 : i32
    %c0_i32_1 = arith.constant 0 : i32
    return %arg0, %c0_i32, %c0_i32_0 : i32, i32, i32
  }
  func.func @transform_1(%arg0: i32) -> (i32, i32) {
    %c0_i32 = arith.constant 0 : i32
    %c0_i32_0 = arith.constant 0 : i32
    %c0_i32_1 = arith.constant 0 : i32
    return %c0_i32, %c0_i32_0 : i32, i32
  }
  func.func @transform_2(%arg0: i32) -> (i32, i32) {
    %c0_i32 = arith.constant 0 : i32
    %c0_i32_0 = arith.constant 0 : i32
    %c0_i32_1 = arith.constant 0 : i32
    return %c0_i32, %c0_i32_0 : i32, i32
  }
  func.func @transform_3(%arg0: i32) -> (i32, i32) {
    %c0_i32 = arith.constant 0 : i32
    %c0_i32_0 = arith.constant 0 : i32
    %c0_i32_1 = arith.constant 0 : i32
    return %c0_i32, %c0_i32_0 : i32, i32
  }
  func.func @transform_4(%arg0: i32) -> (i32, i32, i32) {
    %c0_i32 = arith.constant 0 : i32
    %c0_i32_0 = arith.constant 0 : i32
    %c0_i32_1 = arith.constant 0 : i32
    return %arg0, %c0_i32, %c0_i32_0 : i32, i32, i32
  }
}

</mosaic_0001>

<bundles_post_ra>
// kernel: tpu_custom_call.1
= control target key start
LH: loop header
LB: loop body
LE: loop exit
PB: predicated region body
PF: predicated region fallthrough
CT: control target
= control target key end

     0   :  { %9 = vsyncpa [#allocation3], 0  ;;  %s842_s0 = inlined_call_operand.hbm [shape: f32[4,8,32], index: 0, kind: input, shape index: {}]   ;;  %s843_s1 = inlined_call_operand.hbm [shape: f32[8,32], index: 1, kind: input, shape index: {}]   ;;  %s844_s2 = inlined_call_operand.vmem [shape: f32[1,32], index: 2, kind: input, shape index: {}]   ;;  %s845_s3 = inlined_call_operand.vmem [shape: f32[1,32], index: 3, kind: input, shape index: {}]   ;;  %s846_s4 = inlined_call_operand.hbm [shape: f32[4,8,32], index: 4, kind: output, shape index: {}]  }
   0x1   :  { %11 = vsyncpa [#allocation3 + $0x1], 0 }
   0x2   :  { %12 = vsyncpa [#allocation6], 0 }
   0x3   :  { %13 = vsyncpa [#allocation4], 0 }
   0x4   :  { %15 = vsyncpa [#allocation4 + $0x1], 0  ;;  %s628_s15 = smov 0   ;;  %s630_s16 = smov 0  }
   0x5   :  { %s632_s17 = smov 0   ;;  %s634_s18 = smov 0  }
   0x6 LB: > { %s649_s19 = sadd.s32 4294967295, %s594_s18   ;;  %s381_s20 = sadd.s32 4294967294, %s594_s18   ;;  %s594_s18 = sphi %s634_s18, %s871_s18   ;;  %s590_s17 = sphi %s632_s17, %s870_s17   ;;  %s586_s16 = sphi %s630_s16, %s869_s16   ;;  %s582_s15 = sphi %s628_s15, %s868_s15  }
   0x7   : > { %s653_s21 = sadd.s32 1, %s594_s18   ;;  %s28_s22 = sadd.s32 1, %s590_s17 }
   0x8   : > { %s25_s23 = ssub.s32 %s594_s18, %s653_s21  ;;  %p35_p0 = scmp.ne.s32.totalorder %s590_s17, %s586_s16 }
   0x9   : > { %p26_p1 = scmp.eq.s32.totalorder %s25_s23, 0  ;;  %p36_p2 = scmp.eq.s32.totalorder %s594_s18, 0 }
   0xa   : > { %p41_p3 = scmp.ne.s32.totalorder %s586_s16, %s582_s15  ;;  %p847_p4 = scmp.eq.s32.totalorder %s649_s19, 0 }
   0xb   : > { %s665_s24 = scalar_select %p26_p1, %s590_s17, %s28_s22  }
   0xc   : > { %p667_p5 = por %p36_p2, %p35_p0  ;;  %p673_p6 = por %p847_p4, %p41_p3 }
   0xd   : > { %p128_p7 = scmp.eq.s32.totalorder %s649_s19, 1  ;;  %p134_p8 = scmp.eq.s32.totalorder %s381_s20, 1 }
   0xe   : > { %s853_s26 = scalar_select %p673_p6, 1, 0 }
   0xf   : > { %p382_p9 = scmp.ge.s32.totalorder %s594_s18, 1  ;;  %p141_p10 = scmp.lt.s32.totalorder %s594_s18, 3 }
  0x10   : > { %p680_p11 = por %p128_p7, %p35_p0  ;;  %p684_p12 = por %p134_p8, %p41_p3 }
  0x11   : > { %p688_p13 = pnand %p382_p9, %p141_p10  ;;  %s596_s30 = smov [#allocation5]  }
  0x12   : > { %s854_s27 = scalar_select %p680_p11, 1, 0 }
  0x13   : > { %s855_s28 = scalar_select %p684_p12, 1, 0 }
  0x14   : > { %s856_s29 = scalar_select %p688_p13, 1, 0 }
  0x15   : > { %p409_p2 = pneg %p688_p13  ;;  %s154_s5 = sshll.u32 %s596_s30, 4  ;;  %s155_s5 = int_to_ptr.vmem [resolvable:$true] %s154_s5 }
  0x16   : > { %p422_p4 = scmp.lt.s32.totalorder %s594_s18, 2  ;;  %p857_p0 = scmp.eq.s32.totalorder %s649_s19, 0 }
  0x17   : > { %s171_s7 = sand.u32 1, %s590_s17   ;;  %s466_s12 = scalar_lea.hbm %s843_s1, 128 }
  0x18   : > { %p698_p7 = pnand %p409_p2, %p857_p0  ;;  %p705_p3 = pnand %p422_p4, %p667_p5 }
  0x19   : > { %s385_s9 = sshll.u32 %s171_s7, 4  ;;  %p467_p8 = scmp.ne.s32.totalorder %s843_s1, %s466_s12 }
  0x1a   : > { %s859_s8 = scalar_select %p705_p3, 1, 0 }
  0x1b   : > { %p468_p9 = pneg %p698_p7  ;;  %p473_p4 = scmp.lt.u32.totalorder %s466_s12, %s843_s1 }
  0x1d   : > { %p469_p10 = pnand %p468_p9, %p467_p8 }
  0x1f   : > { %p470_p2 = pneg %p469_p10 }
  0x21   : > { %p475_p5 = pnand %p473_p4, %p470_p2 }
  0x23   : > { %478 = shalt.err (!%p475_p5)
}
  0x24   : > { %s479_s23 = scalar_lea.vmem %s155_s5, 128  ;;  %p487_p11 = scmp.lt.s32.totalorder %s155_s5, %s155_s5 }
  0x25   : > { %p480_p0 = scmp.ne.s32.totalorder %s155_s5, %s479_s23  ;;  %p488_p6 = scmp.lt.s32.totalorder %s479_s23, %s479_s23 }
  0x27   : > { %p482_p1 = pnand %p480_p0, %p468_p9  ;;  %p489_p13 = por %p488_p6, %p487_p11 }
  0x29   : > { %p483_p12 = pneg %p482_p1 }
  0x2b   : > { %p490_p3 = pnand %p489_p13, %p483_p12 }
  0x2d   : > { %493 = shalt.err (!%p490_p3)
}
  0x2e   : > { %412 = dma.hbm_to_vmem [thread:$0]  (!%p698_p7), %s843_s1, 128, %s155_s5, [#allocation6]  }
  0x2f   : > { %s399_s10 = sshll.u32 %s594_s18, 8  ;;  %s175_s11 = scalar_lea.vmem [#allocation2], %s385_s9 }
  0x30   : > { %s182_s12 = sshll.u32 %s175_s11, 4  ;;  %s729_s20 = scalar_lea.hbm %s842_s0, %s399_s10  ;;  %s731_s12 = int_to_ptr.vmem [resolvable:$true] %s182_s12 }
  0x31   : > { %s733_s6 = scalar_lea.sflag [#allocation3], %s171_s7  ;;  %s494_s22 = scalar_lea.hbm %s729_s20, 256 }
  0x32   : > { %p495_p6 = scmp.ne.s32.totalorder %s729_s20, %s494_s22  ;;  %p860_p11 = scmp.ne.s32.totalorder %s859_s8, 0 }
  0x33   : > { %s499_s23 = scalar_lea.hbm %s842_s0, 512  ;;  %p500_p7 = scmp.lt.u32.totalorder %s729_s20, %s842_s0 }
  0x34   : > { %p496_p12 = pneg %p860_p11  ;;  %p501_p3 = scmp.lt.u32.totalorder %s499_s23, %s494_s22 }
  0x35   : > { %p503_p9 = scmp.lt.u32.totalorder %s494_s22, %s729_s20 }
  0x36   : > { %p497_p13 = pnand %p496_p12, %p495_p6  ;;  %p502_p8 = por %p501_p3, %p500_p7 }
  0x38   : > { %p498_p1 = pneg %p497_p13  ;;  %p504_p10 = por %p503_p9, %p502_p8 }
  0x3a   : > { %p505_p2 = pnand %p504_p10, %p498_p1 }
  0x3c   : > { %508 = shalt.err (!%p505_p2)
}
  0x3d   : > { %s509_s7 = scalar_lea.vmem %s731_s12, 256  ;;  %s597_s10 = smov [#allocation2]  }
  0x3e   : > { %p510_p4 = scmp.ne.s32.totalorder %s731_s12, %s509_s7  ;;  %s514_s11 = sshll.u32 %s597_s10, 4  ;;  %s515_s11 = int_to_ptr.vmem [resolvable:$false] %s514_s11 }
  0x3f   : > { %s516_s13 = scalar_lea.vmem %s515_s11, 512  ;;  %p517_p6 = scmp.lt.s32.totalorder %s731_s12, %s515_s11 }
  0x40   : > { %p512_p5 = pnand %p510_p4, %p496_p12  ;;  %p518_p13 = scmp.lt.s32.totalorder %s516_s13, %s509_s7 }
  0x42   : > { %p513_p0 = pneg %p512_p5  ;;  %p519_p7 = por %p518_p13, %p517_p6 }
  0x44   : > { %p520_p3 = pnand %p519_p7, %p513_p0 }
  0x46   : > { %523 = shalt.err (!%p520_p3)
}
  0x47   : > { %s598_s14 = smov 128   ;;  %s599_s22 = smov 8  }
  0x48   : > { %416 = dma.hbm_to_vmem [thread:$0]  (!%p860_p11), %s729_s20, 256, %s731_s12, %s733_s6, %s598_s14, %s598_s14, %s599_s22  }
  0x49   : > { %p861_p12 = scmp.ne.s32.totalorder %s856_s29, 0 }
  0x4a   : > { %s764_s5 = sand.u32 (!%p861_p12), 1, %s586_s16   ;;  %p862_p1 = scmp.ne.s32.totalorder (!%p861_p12), %s853_s26, 0 }
  0x4b   : > { %194 = sbr.rel (%p861_p12) target bundleno = 422 (0x1a6), region = 36  ;;  %s389_s9 = sshll.u32 (!%p861_p12), %s764_s5, 4 }
  0x4c   : > { %s197_s23 = scalar_lea.sflag (!%p861_p12), [#allocation3], %s764_s5  ;;  %s200_s25 = scalar_lea.vmem (!%p861_p12), [#allocation2], %s389_s9 }
  0x52   : > { %569 = dma.done.wait (%p862_p1), %s197_s23, 256  }
  0x53   : > { %571 = vsyncadd (%p862_p1), %s197_s23, 4294967040  ;;  %p863_p11 = scmp.eq.s32.totalorder %s649_s19, 0 }
  0x55   : > { %573 = dma.done.wait (%p863_p11), [#allocation6], 128   ;;  %p864_p8 = pmov %p863_p11 }
  0x56   : > { %v231_v0 = vld [vmem:[%s200_s25] sm:$0xff]  ;;  %vm238_vm0 = vcmask 261120   ;;  %v232_v2 = vld [vmem:[%s200_s25 + $0x8] sm:$0xff]  ;;  %s400_s20 = sshll.u32 %s649_s19, 8  ;;  %s228_s6 = scalar_lea.vmem [#allocation7], %s389_s9 }
  0x57   : > { %575 = vsyncadd (%p864_p8), [#allocation6], 4294967168  ;;  %v233_v1 = vld [vmem:[#allocation5] sm:$0xff]  ;;  %s298_s30 = sshll.u32 %s228_s6, 4  ;;  %s795_s11 = scalar_lea.hbm %s846_s4, %s400_s20  ;;  %s797_s30 = int_to_ptr.vmem [resolvable:$true] %s298_s30 }
  0x58   : > { %v234_v3 = vadd.f32 %v233_v1, %v231_v0  ;;  %v235_v4 = vadd.f32 %v233_v1, %v232_v2  ;;  %v392_v24 = vld [vmem:[%s844_s2] ss:$0 sm:$0xff]  ;;  %s285_s19 = scalar_lea.sflag [#allocation4], %s764_s5  ;;  %s524_s13 = scalar_lea.vmem %s797_s30, 256 }
  0x59   : > { %v393_v26 = vld [vmem:[%s845_s3] ss:$0 sm:$0xff]  ;;  %p525_p9 = scmp.ne.s32.totalorder %s797_s30, %s524_s13  ;;  %p865_p10 = scmp.ne.s32.totalorder %s854_s27, 0 }
  0x5a   : > { %v239_v5 = vsel %vm238_vm0, %v234_v3, 0.0  ;;  %v242_v6 = vsel %vm238_vm0, %v235_v4, 0.0  ;;  %s600_s14 = smov [#allocation7]  }
  0x5b   : > { %240 = vadd.xlane.f32.xlu0 %v239_v5  ;;  %p526_p2 = pnand %p525_p9, %p865_p10  ;;  %s528_s22 = sshll.u32 %s600_s14, 4  ;;  %s529_s22 = int_to_ptr.vmem [resolvable:$false] %s528_s22 }
  0x5c   : > { %s530_s9 = scalar_lea.vmem %s529_s22, 512  ;;  %p531_p5 = scmp.lt.s32.totalorder %s797_s30, %s529_s22 }
  0x5d   : > { %p527_p4 = pneg %p526_p2  ;;  %p532_p0 = scmp.lt.s32.totalorder %s530_s9, %s524_s13 }
  0x5f   : > { %243 = vadd.xlane.f32.xlu0 %v242_v6  ;;  %p533_p6 = por %p532_p0, %p531_p5 }
  0x61   : > { %p534_p13 = pnand %p533_p6, %p527_p4 }
  0xe8   : > { %v241_v7 = vpop.xlane.xlu0 %240 }
  0xe9   : > { %v246_v8 = vmul.f32 0.03125, %v241_v7 }
  0xeb   : > { %v248_v9 = vsub.f32 %v234_v3, %v246_v8 }
  0xec   : > { %v244_v10 = vpop.xlane.xlu0 %243 }
  0xed   : > { %v247_v11 = vmul.f32 0.03125, %v244_v10  ;;  %v250_v12 = vmul.f32 %v248_v9, %v248_v9 }
  0xef   : > { %v249_v13 = vsub.f32 %v235_v4, %v247_v11  ;;  %v252_v14 = vsel %vm238_vm0, %v250_v12, 0.0 }
  0xf0   : > { %253 = vadd.xlane.f32.xlu1 %v252_v14 }
  0xf1   : > { %v251_v15 = vmul.f32 %v249_v13, %v249_v13 }
  0xf3   : > { %v255_v16 = vsel %vm238_vm0, %v251_v15, 0.0 }
  0xf4   : > { %256 = vadd.xlane.f32.xlu1 %v255_v16 }
 0x17d   : > { %v254_v17 = vpop.xlane.xlu1 %253 }
 0x17e   : > { %v258_v18 = vmul.f32 0.03125, %v254_v17 }
 0x180   : > { %v260_v19 = vadd.f32 1e-12, %v258_v18 }
 0x181   : > { %v257_v20 = vpop.xlane.xlu1 %256 }
 0x182   : > { %462 = vrsqrt.f32 %v260_v19  ;;  %v259_v21 = vmul.f32 0.03125, %v257_v20 }
 0x184   : > { %v261_v22 = vadd.f32 1e-12, %v259_v21 }
 0x186   : > { %464 = vrsqrt.f32 %v261_v22 }
 0x18c   : > { %v463_v23 = vpop.eup %462 }
 0x18d   : > { %v264_v25 = vmul.f32 %v463_v23, %v248_v9 }
 0x18f   : > { %v272_v27 = vmul.f32 %v392_v24, %v264_v25 }
 0x190   : > { %v465_v28 = vpop.eup %464 }
 0x191   : > { %v280_v29 = vadd.f32 %v393_v26, %v272_v27  ;;  %v265_v30 = vmul.f32 %v465_v28, %v249_v13 }
 0x193   : > { %v273_v31 = vmul.f32 %v392_v24, %v265_v30  ;;  %282 = vst.msk [vmem:[%s228_s6] sm:$0xff] %vm238_vm0, %v280_v29 }
 0x195   : > { %v281_v32 = vadd.f32 %v393_v26, %v273_v31 }
 0x197   : > { %283 = vst.msk [vmem:[%s228_s6 + $0x8] sm:$0xff] %vm238_vm0, %v281_v32 }
 0x198   : > { %537 = shalt.err (!%p534_p13)
}
 0x199   : > { %s538_s23 = scalar_lea.hbm %s795_s11, 256  ;;  %s542_s29 = scalar_lea.hbm %s846_s4, 512 }
 0x19a   : > { %p539_p7 = scmp.ne.s32.totalorder %s795_s11, %s538_s23  ;;  %p543_p1 = scmp.lt.u32.totalorder %s795_s11, %s846_s4 }
 0x19b   : > { %p544_p11 = scmp.lt.u32.totalorder %s542_s29, %s538_s23  ;;  %p546_p9 = scmp.lt.u32.totalorder %s538_s23, %s795_s11 }
 0x19c   : > { %p540_p3 = pnand %p539_p7, %p865_p10 }
 0x19d   : > { %p545_p8 = por %p544_p11, %p543_p1 }
 0x19e   : > { %p541_p12 = pneg %p540_p3 }
 0x19f   : > { %p547_p2 = por %p546_p9, %p545_p8 }
 0x1a1   : > { %p548_p4 = pnand %p547_p2, %p541_p12 }
 0x1a3   : > { %551 = shalt.err (!%p548_p4)
}
 0x1a4   : > { %s601_s20 = smov 128   ;;  %s602_s6 = smov 8  }
 0x1a5   : > { %407 = dma.vmem_to_hbm [thread:$0]  (%p865_p10), %s797_s30, 256, %s795_s11, %s285_s19, %s601_s20, %s601_s20, %s602_s6  }
 0x1a6 PF: > { %s313_s7 = sand.u32 1, %s582_s15   ;;  %p866_p5 = scmp.ne.s32.totalorder %s855_s28, 0 }
 0x1a7   : > { %p867_p0 = scmp.ge.s32.totalorder %s594_s18, 2  ;;  %s314_s10 = scalar_lea.sflag [#allocation4], %s313_s7 }
 0x1a9   : > { %p418_p6 = pnand %p867_p0, %p866_p5 }
 0x1ab   : > { %577 = dma.done.wait (!%p418_p6), %s314_s10, 256  }
 0x1ac   : > { %579 = vsyncadd (!%p418_p6), %s314_s10, 4294967040  ;;  %p18_p13 = scmp.ge.s32.totalorder %s653_s21, 4   ;;  %s868_s15 = smov %s586_s16 }
 0x1ad   : > { %s869_s16 = smov %s590_s17  ;;  %s870_s17 = smov %s665_s24 }
 0x1ae   : > { %s871_s18 = smov %s653_s21  ;;  %20 = sbr.rel (!%p18_p13) target bundleno = 6 (0x6), region = 85 }
 0x1b5   :  { %319 = vsyncpa [#allocation3], 1 }
 0x1b6   :  { %321 = vsyncpa [#allocation3 + $0x1], 1 }
 0x1b7   :  { %322 = vsyncpa [#allocation6], 1 }
 0x1b8   :  { %323 = vsyncpa [#allocation4], 1 }
 0x1b9   :  { %325 = vsyncpa [#allocation4 + $0x1], 1 }

</bundles_post_ra>
